<compile_context>
chip_gen: v6e
topology: v6e:2x2x1
jax: 0.10.0
libtpu: 0.0.40
codegen_flags: <defaults>
</compile_context>

<pallas_src>
import functools

import jax
import jax.numpy as jnp
from jax import lax
from jax.experimental import pallas as pl
from jax.experimental.pallas import tpu as pltpu


def _mix32(x):
    """lowbias32 finalizer: uint32 -> uint32 avalanche hash (pure VPU ops)."""
    x = x ^ (x >> 16)
    x = x * jnp.uint32(0x7FEB352D)
    x = x ^ (x >> 15)
    x = x * jnp.uint32(0x846CA68B)
    x = x ^ (x >> 16)
    return x


def _reward_kernel(seed_ref, out_ref):
    """Fill out_ref[blk_rows, 128] with iid standard normals.

    seed_ref : SMEM scalar-prefetch ref, int32[1]
    out_ref  : VMEM ref, float32[blk_rows, 128] (blk_rows multiple of 16)
    Block size / row count come from out_ref.shape (static), so the kernel
    function object is identical across batch sizes (stable jit identity).
    """
    rows = out_ref.shape[0]
    half = rows // 2  # multiple of 8 -> aligned sublane stores

    # Globally-unique counters per element: block id offsets the row counter,
    # so every grid block (and both Box-Muller halves) draws distinct bits.
    blk_id = pl.program_id(0)
    r_idx = lax.broadcasted_iota(jnp.int32, (half, 128), 0)
    c_idx = lax.broadcasted_iota(jnp.int32, (half, 128), 1)
    ctr = ((blk_id * half + r_idx) * 128 + c_idx).astype(jnp.uint32)

    seed = seed_ref[0].astype(jnp.uint32)
    base = ctr + seed * jnp.uint32(0x9E3779B9)

    # Two decorrelated 32-bit streams from the same counter.
    bits1 = _mix32(base ^ jnp.uint32(0x68E31DA4))
    bits2 = _mix32(base ^ jnp.uint32(0xB5297A4D))

    # Uniforms strictly inside (0, 1): top 23 bits + half-ulp offset.
    scale = jnp.float32(1.0 / (1 << 23))
    u1 = ((bits1 >> 9).astype(jnp.int32).astype(jnp.float32) + 0.5) * scale
    u2 = ((bits2 >> 9).astype(jnp.int32).astype(jnp.float32) + 0.5) * scale

    # Box-Muller, both branches (log/sqrt/cos/sin -> EUP slot, rest VPU).
    r = jnp.sqrt(-2.0 * jnp.log(u1))
    theta = jnp.float32(2.0 * 3.14159265358979) * u2

    out_ref[0:half, :] = r * jnp.cos(theta)
    out_ref[half:rows, :] = r * jnp.sin(theta)


# Per-block output cap: 512*128*4 B = 256 KiB (x2 pipeline buffers) — safely
# inside v7x's 64 MiB VMEM even at huge batch, and lets writeback pipeline.
_BLOCK_ROWS = 512


@functools.lru_cache(maxsize=None)
def _seed_array(seed: int) -> jax.Array:
    """One-time host->device conversion for integer seeds (cached)."""
    return jnp.asarray([seed], dtype=jnp.int32)


@functools.lru_cache(maxsize=None)
def _build_reward_fn(batch: int):
    """Build (once per batch size) the jitted pallas_call + fused epilogue."""
    # Lane-dense slab: rows * 128 >= batch, rows multiple of 16 (min 16) so
    # each Box-Muller half is an aligned multiple-of-8 sublane block.
    rows = max(16, 16 * pl.cdiv(batch, 16 * 128))

    if rows > _BLOCK_ROWS:
        # Large batch: tile rows and shard blocks across cores (v7x megacore).
        rows = _BLOCK_ROWS * pl.cdiv(rows, _BLOCK_ROWS)
        blk = _BLOCK_ROWS
        semantics = ("parallel",)
    else:
        # Typical tiny batch: single block, no per-step grid overhead.
        blk = rows
        semantics = ("arbitrary",)
    grid = (rows // blk,)

    call = pl.pallas_call(
        _reward_kernel,
        out_shape=jax.ShapeDtypeStruct((rows, 128), jnp.float32),
        grid_spec=pltpu.PrefetchScalarGridSpec(
            num_scalar_prefetch=1,   # seed: int32[1] in SMEM, traced (no retrace per seed)
            grid=grid,
            in_specs=[],             # no tensor inputs at all
            out_specs=pl.BlockSpec((blk, 128), lambda i, seed_ref: (i, 0)),
        ),
        compiler_params=pltpu.CompilerParams(
            dimension_semantics=semantics,
        ),
    )

    @jax.jit
    def fn(seed_arr: jax.Array) -> jax.Array:
        out = call(seed_arr)
        # logits = "torch.randn(batch)": contiguous flatten + slice, fused
        # under the same jit (no extra dispatch / HBM round trip).
        return out.reshape(-1)[:batch]

    return fn


def mock_reward_model_forward(input_ids: jax.Array, seed=0) -> jax.Array:
    """Pallas equivalent of MockRewardModel.__call__: returns logits (batch,) f32.

    `input_ids` is used shape-only (the mock ignores token values).  `seed`
    may be a Python int (converted to a device array once and cached) or a
    device-resident int32[1] array (preferred on hot paths: zero host->device
    traffic, and distinct seed values reuse the same compilation).
    """
    batch = input_ids.shape[0]
    fn = _build_reward_fn(batch)
    if isinstance(seed, jax.Array):
        seed_arr = seed
    else:
        seed_arr = _seed_array(int(seed))
    return fn(seed_arr)


if __name__ == "__main__":
    key = jax.random.PRNGKey(0)
    batch, seq = 2, 8
    # input_ids: LongTensor in PyTorch; int32 token ids here (contents unused).
    input_ids = jax.random.randint(
        key, (batch, seq), minval=0, maxval=1000, dtype=jnp.int32
    )

    # Device-resident seed (created once; reused across calls with no H2D copy).
    seed_arr = _seed_array(0)

    logits = mock_reward_model_forward(input_ids, seed=seed_arr)
    logits = jax.block_until_ready(logits)

    # Second call hits the lru_cache'd jitted function (dispatch-only).
    logits2 = jax.block_until_ready(mock_reward_model_forward(input_ids, seed=seed_arr))

    assert logits.shape == (batch,), logits.shape
    assert logits.dtype == jnp.float32, logits.dtype
    assert bool(jnp.all(jnp.isfinite(logits)))
    assert logits2.shape == (batch,)

    print("KERNEL_OK")
</pallas_src>

<mosaic_0001>
module attributes {stable_mosaic.version = 11 : i64} {
  func.func @_reward_kernel(%arg0: i32, %arg1: memref<1xi32, #tpu.memory_space<smem>>, %arg2: memref<16x128xf32, #tpu.memory_space<vmem>>) attributes {dimension_semantics = [#tpu.dimension_semantics<arbitrary>], iteration_bounds = array<i64: 1>, scalar_prefetch = 1 : i64, scratch_operands = 0 : i64, tpu.core_type = #tpu.core_type<tc>, window_params = [{transform_indices = @transform_0, window_bounds = array<i64: 16, 128>}]} {
    %0 = tpu.iota {dimensions = array<i32: 0>} : vector<8x128xi32>
    %1 = tpu.iota {dimensions = array<i32: 1>} : vector<8x128xi32>
    %c8_i32 = arith.constant 8 : i32
    %2 = arith.muli %arg0, %c8_i32 : i32
    %3 = vector.broadcast %2 : i32 to vector<8x128xi32>
    %4 = arith.addi %3, %0 : vector<8x128xi32>
    %c128_i32 = arith.constant 128 : i32
    %5 = vector.broadcast %c128_i32 : i32 to vector<8x128xi32>
    %6 = arith.muli %4, %5 : vector<8x128xi32>
    %7 = arith.addi %6, %1 : vector<8x128xi32>
    %c0 = arith.constant 0 : index
    %8 = memref.load %arg1[%c0] : memref<1xi32, #tpu.memory_space<smem>>
    %c-1640531527_i32 = arith.constant -1640531527 : i32
    %9 = arith.muli %8, %c-1640531527_i32 : i32
    %10 = vector.broadcast %9 : i32 to vector<8x128xi32>
    %11 = arith.addi %7, %10 : vector<8x128xi32>
    %c1759714724_i32 = arith.constant 1759714724 : i32
    %12 = vector.broadcast %c1759714724_i32 : i32 to vector<8x128xi32>
    %13 = arith.xori %11, %12 : vector<8x128xi32>
    %c16_i32 = arith.constant 16 : i32
    %14 = vector.broadcast %c16_i32 : i32 to vector<8x128xi32>
    %15 = arith.shrui %13, %14 : vector<8x128xi32>
    %16 = arith.xori %13, %15 : vector<8x128xi32>
    %c2146121005_i32 = arith.constant 2146121005 : i32
    %17 = vector.broadcast %c2146121005_i32 : i32 to vector<8x128xi32>
    %18 = arith.muli %16, %17 : vector<8x128xi32>
    %c15_i32 = arith.constant 15 : i32
    %19 = vector.broadcast %c15_i32 : i32 to vector<8x128xi32>
    %20 = arith.shrui %18, %19 : vector<8x128xi32>
    %21 = arith.xori %18, %20 : vector<8x128xi32>
    %c-2073254261_i32 = arith.constant -2073254261 : i32
    %22 = vector.broadcast %c-2073254261_i32 : i32 to vector<8x128xi32>
    %23 = arith.muli %21, %22 : vector<8x128xi32>
    %c16_i32_0 = arith.constant 16 : i32
    %24 = vector.broadcast %c16_i32_0 : i32 to vector<8x128xi32>
    %25 = arith.shrui %23, %24 : vector<8x128xi32>
    %26 = arith.xori %23, %25 : vector<8x128xi32>
    %c-1255572915_i32 = arith.constant -1255572915 : i32
    %27 = vector.broadcast %c-1255572915_i32 : i32 to vector<8x128xi32>
    %28 = arith.xori %11, %27 : vector<8x128xi32>
    %c16_i32_1 = arith.constant 16 : i32
    %29 = vector.broadcast %c16_i32_1 : i32 to vector<8x128xi32>
    %30 = arith.shrui %28, %29 : vector<8x128xi32>
    %31 = arith.xori %28, %30 : vector<8x128xi32>
    %c2146121005_i32_2 = arith.constant 2146121005 : i32
    %32 = vector.broadcast %c2146121005_i32_2 : i32 to vector<8x128xi32>
    %33 = arith.muli %31, %32 : vector<8x128xi32>
    %c15_i32_3 = arith.constant 15 : i32
    %34 = vector.broadcast %c15_i32_3 : i32 to vector<8x128xi32>
    %35 = arith.shrui %33, %34 : vector<8x128xi32>
    %36 = arith.xori %33, %35 : vector<8x128xi32>
    %c-2073254261_i32_4 = arith.constant -2073254261 : i32
    %37 = vector.broadcast %c-2073254261_i32_4 : i32 to vector<8x128xi32>
    %38 = arith.muli %36, %37 : vector<8x128xi32>
    %c16_i32_5 = arith.constant 16 : i32
    %39 = vector.broadcast %c16_i32_5 : i32 to vector<8x128xi32>
    %40 = arith.shrui %38, %39 : vector<8x128xi32>
    %41 = arith.xori %38, %40 : vector<8x128xi32>
    %c9_i32 = arith.constant 9 : i32
    %42 = vector.broadcast %c9_i32 : i32 to vector<8x128xi32>
    %43 = arith.shrui %26, %42 : vector<8x128xi32>
    %44 = arith.sitofp %43 : vector<8x128xi32> to vector<8x128xf32>
    %cst = arith.constant 5.000000e-01 : f32
    %45 = vector.broadcast %cst : f32 to vector<8x128xf32>
    %46 = arith.addf %44, %45 : vector<8x128xf32>
    %cst_6 = arith.constant 1.1920929E-7 : f32
    %47 = vector.broadcast %cst_6 : f32 to vector<8x128xf32>
    %48 = arith.mulf %46, %47 : vector<8x128xf32>
    %c9_i32_7 = arith.constant 9 : i32
    %49 = vector.broadcast %c9_i32_7 : i32 to vector<8x128xi32>
    %50 = arith.shrui %41, %49 : vector<8x128xi32>
    %51 = arith.sitofp %50 : vector<8x128xi32> to vector<8x128xf32>
    %cst_8 = arith.constant 5.000000e-01 : f32
    %52 = vector.broadcast %cst_8 : f32 to vector<8x128xf32>
    %53 = arith.addf %51, %52 : vector<8x128xf32>
    %cst_9 = arith.constant 1.1920929E-7 : f32
    %54 = vector.broadcast %cst_9 : f32 to vector<8x128xf32>
    %55 = arith.mulf %53, %54 : vector<8x128xf32>
    %56 = math.log %48 : vector<8x128xf32>
    %cst_10 = arith.constant -2.000000e+00 : f32
    %57 = vector.broadcast %cst_10 : f32 to vector<8x128xf32>
    %58 = arith.mulf %57, %56 : vector<8x128xf32>
    %59 = math.sqrt %58 : vector<8x128xf32>
    %cst_11 = arith.constant 6.28318548 : f32
    %60 = vector.broadcast %cst_11 : f32 to vector<8x128xf32>
    %61 = arith.mulf %60, %55 : vector<8x128xf32>
    %62 = math.cos %61 : vector<8x128xf32>
    %63 = arith.mulf %59, %62 : vector<8x128xf32>
    %c0_12 = arith.constant 0 : index
    %c0_13 = arith.constant 0 : index
    %64 = vector.load %arg2[%c0_12, %c0_13] : memref<16x128xf32, #tpu.memory_space<vmem>>, vector<8x128xf32>
    tpu.vector_store %arg2[%c0_12, %c0_13], %63 {strides = array<i32>} : memref<16x128xf32, #tpu.memory_space<vmem>>, vector<8x128xf32>,
    %65 = math.sin %61 : vector<8x128xf32>
    %66 = arith.mulf %59, %65 : vector<8x128xf32>
    %c8 = arith.constant 8 : index
    %c0_14 = arith.constant 0 : index
    %67 = vector.load %arg2[%c8, %c0_14] : memref<16x128xf32, #tpu.memory_space<vmem>>, vector<8x128xf32>
    tpu.vector_store %arg2[%c8, %c0_14], %66 {strides = array<i32>} : memref<16x128xf32, #tpu.memory_space<vmem>>, vector<8x128xf32>,
    return
  }
  func.func @transform_0(%arg0: i32, %arg1: memref<1xi32, #tpu.memory_space<smem>>) -> (i32, i32) {
    %c0_i32 = arith.constant 0 : i32
    %c0_i32_0 = arith.constant 0 : i32
    return %arg0, %c0_i32 : i32, i32
  }
}

</mosaic_0001>

<bundles_post_ra>
// kernel: fn.1
= control target key start
LH: loop header
LB: loop body
LE: loop exit
PB: predicated region body
PF: predicated region fallthrough
CT: control target
= control target key end

     0   :  { %v7_v0 = vlaneseq  ;;  %v298_v41 = vmov 683565275   ;;  %v299_v43 = vmov 2475754826   ;;  %v300_v45 = vmov 2131351028   ;;  %s347_s0 = inlined_call_operand.<no memory space> [shape: s32[1], index: 0, kind: input, shape index: {}]   ;;  %s348_s1 = inlined_call_operand.vmem [shape: f32[16,128], index: 1, kind: output, shape index: {}]  }
   0x1   :  { %s17_s8 = smul.u32 2654435769, %s347_s0  ;;  %v301_v47 = vmov 2102212464   ;;  %v302_v51 = vmov 920167782  }
   0x2   :  { %v8_v1 = vshrl.u32 %v7_v0, 7  ;;  %v10_v2 = vand.u32 127, %v7_v0  ;;  %v303_v56 = vmov 1326507024  }
   0x3   :  { %v18_v4 = vstv %s17_s8 }
   0x4   :  { %v14_v3 = vmul.u32 128, %v8_v1 }
   0x6   :  { %v15_v5 = vadd.s32 %v14_v3, %v10_v2 }
   0x8   :  { %v19_v6 = vadd.s32 %v18_v4, %v15_v5 }
   0xa   :  { %v29_v7 = vxor.u32 3039394381, %v19_v6  ;;  %v20_v11 = vxor.u32 1759714724, %v19_v6 }
   0xc   :  { %v30_v8 = vshrl.u32 %v29_v7, 16  ;;  %v21_v14 = vshrl.u32 %v20_v11, 16 }
   0xe   :  { %v31_v9 = vxor.u32 %v30_v8, %v29_v7  ;;  %v22_v17 = vxor.u32 %v21_v14, %v20_v11 }
  0x10   :  { %v32_v10 = vmul.u32 2146121005, %v31_v9  ;;  %v23_v20 = vmul.u32 2146121005, %v22_v17 }
  0x12   :  { %v33_v12 = vshrl.u32 %v32_v10, 15  ;;  %v24_v23 = vshrl.u32 %v23_v20, 15 }
  0x14   :  { %v34_v13 = vxor.u32 %v33_v12, %v32_v10  ;;  %v25_v26 = vxor.u32 %v24_v23, %v23_v20 }
  0x16   :  { %v35_v15 = vmul.u32 2221713035, %v34_v13  ;;  %v26_v29 = vmul.u32 2221713035, %v25_v26 }
  0x18   :  { %v36_v16 = vshrl.u32 %v35_v15, 16  ;;  %v27_v33 = vshrl.u32 %v26_v29, 16 }
  0x1a   :  { %v37_v18 = vxor.u32 %v36_v16, %v35_v15  ;;  %v28_v37 = vxor.u32 %v27_v33, %v26_v29 }
  0x1c   :  { %v42_v19 = vshrl.u32 %v37_v18, 9  ;;  %v38_v58 = vshrl.u32 %v28_v37, 9 }
  0x1e   :  { %v43_v21 = vcvt.s32.f32 %v42_v19  ;;  %v39_v15 = vcvt.s32.f32 %v38_v58 }
  0x20   :  { %v44_v22 = vadd.f32 0.5, %v43_v21  ;;  %v40_v20 = vadd.f32 0.5, %v39_v15 }
  0x22   :  { %v45_v24 = vmul.f32 1.1920929e-07, %v44_v22  ;;  %v41_v23 = vmul.f32 1.1920929e-07, %v40_v20 }
  0x24   :  { %v317_v25 = vmul.f32 6.2831855, %v45_v24  ;;  %290 = vlog2.f32 %v41_v23 }
  0x26   :  { %v60_v27 = vand.u32 2139095040, %v317_v25  ;;  %v57_v30 = vand.u32 2147483647, %v317_v25  ;;  %vm59_vm7 = vcmp.lt.s32.totalorder %v317_v25, 0 }
  0x28   :  { %v61_v28 = vshrl.u32 %v60_v27, 23  ;;  %v64_v34 = vand.u32 8388607, %v57_v30  ;;  %vm58_vm8 = vcmp.le.f32.partialorder %v57_v30, 0.7853982 }
  0x2a   :  { %v272_v31 = vadd.s32 4294967169, %v61_v28  ;;  %v65_v38 = vor.u32 8388608, %v64_v34 }
  0x2c   :  { %v67_v32 = vadd.s32 1, %v272_v31  ;;  %v105_v59 = vshll.u32 %v65_v38, 8 }
  0x2e   :  { %vm68_vm0 = vcmp.gt.s32.totalorder %v67_v32, 0 }
  0x2f   :  { %v69_v35 = vsel %vm68_vm0, %v67_v32, 0 }
  0x30   :  { %v71_v36 = vand.u32 31, %v69_v35  ;;  %v70_v39 = vshrl.u32 %v69_v35, 5 }
  0x31   :  { %v291_v35 = vpop.eup %290 }
  0x32   :  { %v72_v40 = vsub.s32 32, %v71_v36  ;;  %v74_v42 = vshll.u32 %v298_v41, %v71_v36  ;;  %v77_v44 = vshll.u32 %v299_v43, %v71_v36  ;;  %v80_v46 = vshll.u32 %v300_v45, %v71_v36 }
  0x33   :  { %v83_v48 = vshll.u32 %v301_v47, %v71_v36  ;;  %v86_v52 = vshll.u32 %v302_v51, %v71_v36  ;;  %vm89_vm1 = vcmp.lt.s32.totalorder %v70_v39, 1  ;;  %vm90_vm2 = vcmp.lt.s32.totalorder %v70_v39, 2 }
  0x34   :  { %v75_v49 = vshrl.u32 %v299_v43, %v72_v40  ;;  %v78_v50 = vshrl.u32 %v300_v45, %v72_v40  ;;  %v73_v53 = vshrl.u32 %v298_v41, %v72_v40  ;;  %v81_v54 = vshrl.u32 %v301_v47, %v72_v40 }
  0x35   :  { %v84_v55 = vshrl.u32 %v302_v51, %v72_v40  ;;  %v87_v57 = vshrl.u32 %v303_v56, %v72_v40  ;;  %vm91_vm3 = vcmp.lt.s32.totalorder %v70_v39, 3  ;;  %vm92_vm4 = vcmp.lt.s32.totalorder %v70_v39, 4 }
  0x36   :  { %v76_v60 = vor.u32 %v75_v49, %v74_v42  ;;  %v79_v61 = vor.u32 %v78_v50, %v77_v44  ;;  %v82_v62 = vor.u32 %v81_v54, %v80_v46  ;;  %v47_v40 = vmul.f32 0.6931472, %v291_v35 }
  0x37   :  { %v85_v63 = vor.u32 %v84_v55, %v83_v48  ;;  %v88_v0 = vor.u32 %v87_v57, %v86_v52 }
  0x38   :  { %v93_v1 = vsel %vm89_vm1, %v73_v53, %v76_v60  ;;  %v94_v2 = vsel %vm92_vm4, %v82_v62, 2102212464  ;;  %v97_v3 = vsel %vm89_vm1, %v76_v60, %v79_v61  ;;  %v101_v7 = vsel %vm89_vm1, %v79_v61, %v82_v62 }
  0x39   :  { %v98_v4 = vsel %vm92_vm4, %v85_v63, 920167782  ;;  %v95_v5 = vsel %vm91_vm3, %v79_v61, %v94_v2  ;;  %v102_v8 = vsel %vm92_vm4, %v88_v0, 1326507024  ;;  %v48_v45 = vmul.f32 -2.0, %v47_v40 }
  0x3a   :  { %v99_v6 = vsel %vm91_vm3, %v82_v62, %v98_v4  ;;  %v103_v10 = vsel %vm91_vm3, %v85_v63, %v102_v8  ;;  %v96_v11 = vsel %vm90_vm2, %v93_v1, %v95_v5  ;;  %vm149_vm1 = vweird.f32 %v317_v25 }
  0x3b   :  { %v100_v9 = vsel %vm90_vm2, %v97_v3, %v99_v6  ;;  %v104_v12 = vsel %vm90_vm2, %v101_v7, %v103_v10  ;;  %v112_v18 = vmul.u32 %v105_v59, %v96_v11  ;;  %292 = vrsqrt.f32 %v48_v45 }
  0x3c   :  { %v326_v13 = vmul.u32.u64.low %v105_v59, %v100_v9  ;;  %v327_v14 = vmul.u32.u64.high %v105_v59, %v100_v9, %v326_v13  ;;  %v329_v16 = vmul.u32.u64.low %v105_v59, %v104_v12  ;;  %v330_v17 = vmul.u32.u64.high %v105_v59, %v104_v12, %v329_v16 }
  0x3d   :  { %vm51_vm9 = vcmp.eq.f32.partialorder %v48_v45, inf  ;;  %vm53_vm10 = vcmp.eq.f32.partialorder %v48_v45, 0.0  ;;  %v54_v62 = vand.u32 2147483648, %v48_v45 }
  0x3e   :  { %v115_v19 = vadd.s32 1, %v327_v14  ;;  %vm114_vm5 = vc.u32 %v330_v17, %v326_v13  ;;  %v113_v34 = vadd.s32 %v326_v13, %v330_v17 }
  0x40   :  { %v116_v21 = vsel %vm114_vm5, %v115_v19, %v327_v14 }
  0x41   :  { %v117_v22 = vadd.s32 %v116_v21, %v112_v18 }
  0x43   :  { %v118_v24 = vadd.s32 536870912, %v117_v22 }
  0x45   :  { %v119_v26 = vshrl.u32 %v118_v24, 30 }
  0x47   :  { %v120_v27 = vshll.u32 %v119_v26, 30  ;;  %v143_v50 = vsub.s32 4, %v119_v26 }
  0x48   :  { %v293_v57 = vpop.eup %292 }
  0x49   :  { %v121_v28 = vsub.s32 %v117_v22, %v120_v27  ;;  %v144_v53 = vsel %vm59_vm7, %v143_v50, %v119_v26  ;;  %v50_v60 = vmul.f32 %v293_v57, %v48_v45 }
  0x4a   :  { %v146_v55 = vsel %vm58_vm8, 0, %v144_v53 }
  0x4b   :  { %v123_v29 = vsub.s32 0, %v121_v28  ;;  %v255_v56 = vadd.s32 3, %v146_v55  ;;  %v150_v58 = vand.u32 3, %v146_v55  ;;  %v52_v63 = vsel %vm51_vm9, %v48_v45, %v50_v60 }
  0x4c   :  { %v55_v4 = vsel %vm53_vm10, %v54_v62, %v52_v63 }
  0x4d   :  { %v273_v31 = vmin.u32 %v123_v29, %v121_v28  ;;  %v256_v59 = vand.u32 3, %v255_v56  ;;  %vm155_vm11 = vcmp.eq.s32.totalorder %v150_v58, 2  ;;  %vm152_vm13 = vcmp.eq.s32.totalorder %v150_v58, 0 }
  0x4e   :  { %vm151_vm15 = vcmp.lt.s32.totalorder %v150_v58, 2 }
  0x4f   :  { %v125_v32 = vclz %v273_v31  ;;  %vm261_vm12 = vcmp.eq.s32.totalorder %v256_v59, 2  ;;  %vm258_vm14 = vcmp.eq.s32.totalorder %v256_v59, 0  ;;  %vm257_vm0 = vcmp.lt.s32.totalorder %v256_v59, 2 }
  0x51   :  { %v274_v33 = vadd.s32 4294967294, %v125_v32 }
  0x53   :  { %vm275_vm6 = vcmp.lt.s32.totalorder %v274_v33, 0 }
  0x54   :  { %v128_v36 = vsel %vm275_vm6, 0, %v274_v33 }
  0x55   :  { %v129_v37 = vsub.s32 32, %v128_v36  ;;  %v130_v38 = vshll.u32 %v121_v28, %v128_v36  ;;  %v133_v39 = vsub.s32 4294967266, %v128_v36 }
  0x57   :  { %v131_v41 = vshrl.u32 %v113_v34, %v129_v37  ;;  %v134_v42 = vadd.s32 127, %v133_v39 }
  0x59   :  { %v132_v43 = vor.u32 %v131_v41, %v130_v38  ;;  %v135_v44 = vshll.u32 %v134_v42, 23 }
  0x5b   :  { %v136_v46 = vor.u32 4788187, %v135_v44  ;;  %v139_v47 = vcvt.s32.f32 %v132_v43 }
  0x5d   :  { %v137_v48 = vand.u32 2147483647, %v136_v46 }
  0x5f   :  { %v140_v49 = vmul.f32 %v139_v47, %v137_v48 }
  0x61   :  { %v141_v51 = vxor.u32 2147483648, %v140_v49 }
  0x63   :  { %v142_v52 = vsel %vm59_vm7, %v141_v51, %v140_v49 }
  0x64   :  { %v145_v54 = vsel %vm58_vm8, %v317_v25, %v142_v52 }
  0x65   :  { %294 = vcosq.f32 %v145_v54 }
  0x66   :  { %296 = vsinq.f32 %v145_v54 }
  0x72   :  { %v295_v61 = vpop.eup %294 }
  0x73   :  { %v297_v30 = vpop.eup %296  ;;  %v156_v0 = vxor.u32 2147483648, %v295_v61 }
  0x74   :  { %v153_v1 = vxor.u32 2147483648, %v297_v30 }
  0x75   :  { %v157_v2 = vsel %vm155_vm11, %v156_v0, %v297_v30  ;;  %v263_v3 = vsel %vm261_vm12, %v156_v0, %v297_v30 }
  0x76   :  { %v154_v5 = vsel %vm152_vm13, %v295_v61, %v153_v1  ;;  %v260_v6 = vsel %vm258_vm14, %v295_v61, %v153_v1 }
  0x77   :  { %v158_v7 = vsel %vm151_vm15, %v154_v5, %v157_v2  ;;  %v264_v8 = vsel %vm257_vm0, %v260_v6, %v263_v3 }
  0x78   :  { %v159_v9 = vsel %vm149_vm1, nan, %v158_v7  ;;  %v265_v10 = vsel %vm149_vm1, nan, %v264_v8 }
  0x79   :  { %v160_v11 = vmul.f32 %v159_v9, %v55_v4  ;;  %v266_v12 = vmul.f32 %v265_v10, %v55_v4 }
  0x7b   :  { %161 = vst [vmem:[%s348_s1] sm:$0xff] %v160_v11  ;;  %267 = vst [vmem:[%s348_s1 + $0x8] sm:$0xff] %v266_v12 }

</bundles_post_ra>
